<compile_context>
chip_gen: v7x
topology: tpu7x:2x2x1
jax: 0.10.0
libtpu: 0.0.40
codegen_flags: <defaults>
</compile_context>

<pallas_src>
import functools

import jax
import jax.numpy as jnp
from jax.experimental import pallas as pl
from jax.experimental.pallas import tpu as pltpu

FL_ALPHA = 1.0  # FocalLoss alpha (fixed by the module: FocalLoss(alpha=1, gamma=2))
# FocalLoss gamma == 2 is applied as an explicit square (no generic pow).


def _make_nll_sum_kernel(n_rows, tile_n, tiles_per_core):
    """Kernel computing, per 'core' (parallel grid index), sum_i -log p(target_i)."""

    def kernel(logits_ref, target_ref, out_ref):
        c = pl.program_id(0)  # parallel (megacore) split of the batch
        t = pl.program_id(1)  # row-tile index within this core's shard

        @pl.when(t == 0)
        def _():
            out_ref[...] = jnp.zeros_like(out_ref)

        logits = logits_ref[...].astype(jnp.float32)  # (tile_n, C), cast in-kernel
        labels = target_ref[...]                      # (tile_n, 1) int32
        tn, nc = logits.shape

        # one-hot selection mask of the target class per row (pure VPU work,
        # hidden under the logits DMA stream)
        col_ids = jax.lax.broadcasted_iota(jnp.int32, (tn, nc), 1)
        onehot = col_ids == labels

        # numerically-stable log-softmax + gather of the target log-prob
        m = jnp.max(logits, axis=-1, keepdims=True)
        shifted = logits - m
        lse = jnp.log(jnp.sum(jnp.exp(shifted), axis=-1, keepdims=True))
        logp_t = (
            jnp.sum(jnp.where(onehot, shifted, 0.0), axis=-1, keepdims=True) - lse
        )  # (tile_n, 1)

        # mask rows past the true batch size (clamped / partial tiles)
        row_start = (c * tiles_per_core + t) * tile_n
        row_ids = row_start + jax.lax.broadcasted_iota(jnp.int32, (tn, 1), 0)
        valid = row_ids < n_rows
        nll = jnp.where(valid, -logp_t, 0.0)

        # accumulate into the resident output block (broadcast over the 128 lanes)
        out_ref[...] += jnp.sum(nll, keepdims=True)

    return kernel


def combined_loss(logits, target, *, alpha, beta, gamma,
                  tile_n=None, num_cores=2):
    """logits: (N, C) float (any dtype), target: (N,) int class ids -> scalar f32."""
    n, c = logits.shape
    target_2d = target.astype(jnp.int32).reshape(n, 1)

    # Row-tile sizing: keep double-buffered logits tiles (2 bufs x tile bytes)
    # plus f32 compute intermediates comfortably inside v7x's 32 MiB default
    # scoped VMEM (physical VMEM is only 64 MiB on v7x).
    if tile_n is None:
        itemsize = jnp.dtype(logits.dtype).itemsize
        budget = 4 * 1024 * 1024  # ~4 MiB of logits per tile (native dtype)
        tile_n = max(8, min(1024, budget // max(c * itemsize, 1)))
    if tile_n >= n:
        tile_n = n                      # full batch in one block
    else:
        tile_n = max(8, (tile_n // 8) * 8)  # sublane alignment

    total_tiles = pl.cdiv(n, tile_n)
    tiles_per_core = pl.cdiv(total_tiles, num_cores)

    kernel = _make_nll_sum_kernel(n, tile_n, tiles_per_core)

    def row_block_idx(ci, ti):
        # clamp so DMAs never address past the last (possibly partial) tile;
        # clamped duplicates are fully masked out inside the kernel.
        return (jnp.minimum(ci * tiles_per_core + ti, total_tiles - 1), 0)

    partial = pl.pallas_call(
        kernel,
        out_shape=jax.ShapeDtypeStruct((1, num_cores * 128), jnp.float32),
        grid=(num_cores, tiles_per_core),
        in_specs=[
            pl.BlockSpec((tile_n, c), row_block_idx),
            pl.BlockSpec((tile_n, 1), row_block_idx),
        ],
        out_specs=pl.BlockSpec((1, 128), lambda ci, ti: (0, ci)),
        compiler_params=pltpu.CompilerParams(
            dimension_semantics=("parallel", "arbitrary")),
    )(logits, target_2d)

    # every lane of a core's (1,128) output block holds the same partial sum
    nll_sum = jnp.sum(partial[0].reshape(num_cores, 128)[:, 0])

    # ---- tiny scalar epilogue (a handful of scalar ops; done in the wrapper) ----
    ce = nll_sum * jnp.float32(1.0 / n)          # CrossEntropyLoss (mean)
    pt = jnp.exp(-ce)
    one_minus_pt = 1.0 - pt
    focal = jnp.float32(FL_ALPHA) * one_minus_pt * one_minus_pt * ce  # gamma=2 -> explicit square
    # KLDivLoss(log_softmax(y_pred), one_hot(y_true), reduction='batchmean'):
    # for a 0/1 one-hot target, xlogy(t, t) == 0, so it reduces exactly to
    # sum_i -log p(target_i) / N  ==  ce.
    kldiv = ce
    return alpha * ce + beta * focal + gamma * kldiv


def combined_loss_ref(logits, target, *, alpha, beta, gamma):
    lp = jax.nn.log_softmax(logits.astype(jnp.float32), axis=-1)
    n, c = logits.shape
    nll = -jnp.take_along_axis(lp, target[:, None].astype(jnp.int32), axis=-1)
    ce = jnp.mean(nll)
    pt = jnp.exp(-ce)
    focal = FL_ALPHA * (1.0 - pt) ** 2 * ce
    onehot = jax.nn.one_hot(target, c, dtype=jnp.float32)
    kldiv = jnp.sum(onehot * (0.0 - lp)) / n  # xlogy(onehot, onehot) == 0
    return alpha * ce + beta * focal + gamma * kldiv


if __name__ == "__main__":
    key = jax.random.PRNGKey(0)
    k1, k2 = jax.random.split(key)

    N, C = 100, 32  # small demo; N not a multiple of the tile to exercise masking
    ALPHA, BETA, GAMMA = 0.5, 0.3, 0.2  # CombinedLoss weights

    logits = jax.random.normal(k1, (N, C), dtype=jnp.float32)
    target = jax.random.randint(k2, (N,), 0, C, dtype=jnp.int32)

    out = combined_loss(logits, target, alpha=ALPHA, beta=BETA, gamma=GAMMA,
                        tile_n=16, num_cores=2)
    out = jax.block_until_ready(out)

    ref = combined_loss_ref(logits, target, alpha=ALPHA, beta=BETA, gamma=GAMMA)
    assert jnp.allclose(out, ref, rtol=1e-5, atol=1e-5), (out, ref)
    print("KERNEL_OK")
</pallas_src>

<mosaic_0001>
module attributes {stable_mosaic.version = 11 : i64} {
  func.func @kernel(%arg0: i32, %arg1: i32, %arg2: memref<16x32xf32, #tpu.memory_space<vmem>>, %arg3: memref<16x1xi32, #tpu.memory_space<vmem>>, %arg4: memref<1x128xf32, #tpu.memory_space<vmem>>) attributes {dimension_semantics = [#tpu.dimension_semantics<parallel>, #tpu.dimension_semantics<arbitrary>], iteration_bounds = array<i64: 2, 4>, scalar_prefetch = 0 : i64, scratch_operands = 0 : i64, tpu.core_type = #tpu.core_type<tc>, window_params = [{transform_indices = @transform_0, window_bounds = array<i64: 16, 32>}, {transform_indices = @transform_1, window_bounds = array<i64: 16, 1>}, {transform_indices = @transform_2, window_bounds = array<i64: 1, 128>}]} {
    %c0_i32 = arith.constant 0 : i32
    %0 = arith.cmpi eq, %arg1, %c0_i32 : i32
    %1 = arith.extui %0 : i1 to i32
    %c0_i32_0 = arith.constant 0 : i32
    %2 = arith.cmpi ne, %1, %c0_i32_0 : i32
    scf.if %2 {
      %cst_14 = arith.constant 0.000000e+00 : f32
      %42 = vector.broadcast %cst_14 : f32 to vector<1x128xf32>
      %c0_15 = arith.constant 0 : index
      %c0_16 = arith.constant 0 : index
      %43 = vector.load %arg4[%c0_15, %c0_16] : memref<1x128xf32, #tpu.memory_space<vmem>>, vector<1x128xf32>
      tpu.vector_store %arg4[%c0_15, %c0_16], %42 {strides = array<i32>} : memref<1x128xf32, #tpu.memory_space<vmem>>, vector<1x128xf32>,
    } else {
    }
    %c0 = arith.constant 0 : index
    %c0_1 = arith.constant 0 : index
    %3 = vector.load %arg2[%c0, %c0_1] : memref<16x32xf32, #tpu.memory_space<vmem>>, vector<16x32xf32>
    %c0_2 = arith.constant 0 : index
    %c0_3 = arith.constant 0 : index
    %4 = vector.load %arg3[%c0_2, %c0_3] : memref<16x1xi32, #tpu.memory_space<vmem>>, vector<16x1xi32>
    %5 = tpu.iota {dimensions = array<i32: 1>} : vector<16x32xi32>
    %6 = vector.broadcast %4 : vector<16x1xi32> to vector<16x32xi32>
    %7 = arith.cmpi eq, %5, %6 : vector<16x32xi32>
    %cst = arith.constant dense<0xFF800000> : vector<16xf32>
    %8 = vector.multi_reduction <maximumf>, %3, %cst [1] : vector<16x32xf32> to vector<16xf32>
    %9 = vector.shape_cast %8 : vector<16xf32> to vector<16x1xf32>
    %10 = vector.broadcast %9 : vector<16x1xf32> to vector<16x32xf32>
    %11 = arith.subf %3, %10 : vector<16x32xf32>
    %12 = math.exp %11 : vector<16x32xf32>
    %cst_4 = arith.constant dense<0.000000e+00> : vector<16xf32>
    %13 = vector.multi_reduction <add>, %12, %cst_4 [1] : vector<16x32xf32> to vector<16xf32>
    %14 = vector.shape_cast %13 : vector<16xf32> to vector<16x1xf32>
    %15 = math.log %14 : vector<16x1xf32>
    %cst_5 = arith.constant 0.000000e+00 : f32
    %16 = vector.broadcast %cst_5 : f32 to vector<16x32xf32>
    %17 = arith.select %7, %11, %16 : vector<16x32xi1>, vector<16x32xf32>
    %cst_6 = arith.constant dense<0.000000e+00> : vector<16xf32>
    %18 = vector.multi_reduction <add>, %17, %cst_6 [1] : vector<16x32xf32> to vector<16xf32>
    %19 = vector.shape_cast %18 : vector<16xf32> to vector<16x1xf32>
    %20 = arith.subf %19, %15 : vector<16x1xf32>
    %c4_i32 = arith.constant 4 : i32
    %21 = arith.muli %arg0, %c4_i32 : i32
    %22 = arith.addi %21, %arg1 : i32
    %c16_i32 = arith.constant 16 : i32
    %23 = arith.muli %22, %c16_i32 : i32
    %24 = tpu.iota {dimensions = array<i32: 0>} : vector<16x1xi32>
    %25 = vector.broadcast %23 : i32 to vector<16x1xi32>
    %26 = arith.addi %25, %24 : vector<16x1xi32>
    %c100_i32 = arith.constant 100 : i32
    %27 = vector.broadcast %c100_i32 : i32 to vector<16x1xi32>
    %28 = arith.cmpi slt, %26, %27 : vector<16x1xi32>
    %cst_7 = arith.constant 0.000000e+00 : f32
    %29 = vector.broadcast %cst_7 : f32 to vector<16x1xf32>
    %30 = arith.subf %29, %20 : vector<16x1xf32>
    %cst_8 = arith.constant 0.000000e+00 : f32
    %31 = vector.broadcast %cst_8 : f32 to vector<16x1xf32>
    %32 = arith.select %28, %30, %31 : vector<16x1xi1>, vector<16x1xf32>
    %c0_9 = arith.constant 0 : index
    %c0_10 = arith.constant 0 : index
    %33 = vector.load %arg4[%c0_9, %c0_10] : memref<1x128xf32, #tpu.memory_space<vmem>>, vector<1x128xf32>
    %34 = vector.shape_cast %32 : vector<16x1xf32> to vector<1x16x1xf32>
    %cst_11 = arith.constant dense<0.000000e+00> : vector<1xf32>
    %35 = vector.multi_reduction <add>, %34, %cst_11 [1, 2] : vector<1x16x1xf32> to vector<1xf32>
    %36 = vector.shape_cast %35 : vector<1xf32> to vector<1x1x1xf32>
    %37 = vector.extract %36[0, 0, 0] : f32 from vector<1x1x1xf32>
    %38 = vector.broadcast %37 : f32 to vector<1x1xf32>
    %39 = vector.broadcast %38 : vector<1x1xf32> to vector<1x128xf32>
    %40 = arith.addf %33, %39 : vector<1x128xf32>
    %c0_12 = arith.constant 0 : index
    %c0_13 = arith.constant 0 : index
    %41 = vector.load %arg4[%c0_12, %c0_13] : memref<1x128xf32, #tpu.memory_space<vmem>>, vector<1x128xf32>
    tpu.vector_store %arg4[%c0_12, %c0_13], %40 {strides = array<i32>} : memref<1x128xf32, #tpu.memory_space<vmem>>, vector<1x128xf32>,
    return
  }
  func.func @transform_0(%arg0: i32, %arg1: i32) -> (i32, i32) {
    %c4_i32 = arith.constant 4 : i32
    %0 = arith.muli %arg0, %c4_i32 : i32
    %1 = arith.addi %0, %arg1 : i32
    %c6_i32 = arith.constant 6 : i32
    %2 = arith.minsi %1, %c6_i32 : i32
    %c0_i32 = arith.constant 0 : i32
    %c0_i32_0 = arith.constant 0 : i32
    return %2, %c0_i32 : i32, i32
  }
  func.func @transform_1(%arg0: i32, %arg1: i32) -> (i32, i32) {
    %c4_i32 = arith.constant 4 : i32
    %0 = arith.muli %arg0, %c4_i32 : i32
    %1 = arith.addi %0, %arg1 : i32
    %c6_i32 = arith.constant 6 : i32
    %2 = arith.minsi %1, %c6_i32 : i32
    %c0_i32 = arith.constant 0 : i32
    %c0_i32_0 = arith.constant 0 : i32
    return %2, %c0_i32 : i32, i32
  }
  func.func @transform_2(%arg0: i32, %arg1: i32) -> (i32, i32) {
    %c0_i32 = arith.constant 0 : i32
    %c0_i32_0 = arith.constant 0 : i32
    return %c0_i32, %arg0 : i32, i32
  }
}

</mosaic_0001>

<bundles_post_ra>
// kernel: tpu_custom_call.1
= control target key start
LH: loop header
LB: loop body
LE: loop exit
PB: predicated region body
PF: predicated region fallthrough
CT: control target
= control target key end

     0   :  { %7 = vsyncpa [#allocation3], 0  ;;  %s825_s0 = inlined_call_operand.vmem [shape: f32[100,32], index: 0, kind: input, shape index: {}]   ;;  %s826_s1 = inlined_call_operand.vmem [shape: s32[100,1], index: 1, kind: input, shape index: {}]   ;;  %s827_s2 = inlined_call_operand.hbm [shape: f32[1,256], index: 2, kind: output, shape index: {}]  }
   0x1   :  { %9 = vsyncpa [#allocation3 + $0x1], 0  ;;  %s668_s9 = smov 0   ;;  %s670_s10 = smov 0  }
   0x2   :  { %s672_s11 = smov 0   ;;  %s674_s12 = smov 0  }
   0x3   :  { %s676_s13 = smov 0   ;;  %s678_s14 = smov 0  }
   0x4   :  { %s680_s15 = smov 0   ;;  %s682_s16 = smov 0  }
   0x5 LB: > { %s448_s17 = sadd.s32 4294967295, %s648_s16   ;;  %s449_s18 = sadd.s32 4294967294, %s648_s16   ;;  %s648_s16 = sphi %s682_s16, %s15_s16   ;;  %s644_s15 = sphi %s680_s15, %s836_s15   ;;  %s640_s14 = sphi %s678_s14, %s835_s14   ;;  %s636_s13 = sphi %s676_s13, %s834_s13   ;;  %s632_s12 = sphi %s674_s12, %s833_s12   ;;  %s628_s11 = sphi %s672_s11, %s832_s11   ;;  %s624_s10 = sphi %s670_s10, %s831_s10   ;;  %s620_s9 = sphi %s668_s9, %s830_s9  }
   0x6   : > { %s24_s19 = sadd.s32 1, %s640_s14  ;;  %s27_s20 = sadd.s32 1, %s644_s15 }
   0x7   : > { %p25_p0 = scmp.ge.s32.totalorder %s24_s19, 4  ;;  %p112_p1 = scmp.ne.s32.totalorder %s628_s11, %s624_s10 }
   0x8   : > { %p113_p2 = scmp.eq.s32.totalorder %s448_s17, 7  ;;  %p118_p4 = scmp.ne.s32.totalorder %s624_s10, %s620_s9 }
   0x9   : > { %s838_s19 = smov (%p25_p0, %s24_s19), 0  ;;  %s840_s20 = smov (!%p25_p0, %s27_s20), %s644_s15 }
   0xa   : > { %p717_p3 = por %p113_p2, %p112_p1  ;;  %p29_p5 = scmp.ge.s32.totalorder %s840_s20, 2 }
   0xb   : > { %p119_p6 = scmp.eq.s32.totalorder %s449_s18, 7  ;;  %p456_p7 = scmp.ge.s32.totalorder %s648_s16, 1 }
   0xc   : > { %p187_p8 = scmp.lt.s32.totalorder %s648_s16, 9  ;;  %s842_s20 = smov (%p29_p5, %s840_s20), 0 }
   0xd   : > { %p727_p9 = por %p119_p6, %p118_p4  ;;  %s99_s23 = ssub.s32 %s644_s15, %s842_s20 }
   0xe   : > { %p188_p10 = pnand %p456_p7, %p187_p8  ;;  %s102_s24 = sadd.s32 1, %s628_s11 }
   0xf   : > { %p100_p11 = scmp.eq.s32.totalorder %s99_s23, 0  ;;  %s227_s26 = sand.u32 (!%p188_p10), 1, %s624_s10  }
  0x10   : > { %191 = sbr.rel (%p188_p10) target bundleno = 579 (0x243), region = 28  ;;  %s457_s27 = sshll.u32 (!%p188_p10), %s636_s13, 2 }
  0x11   : > { %s735_s25 = scalar_select %p100_p11, %s628_s11, %s102_s24  }
  0x12   : > { %s740_s28 = sadd.s32 (!%p188_p10), %s632_s12, %s457_s27  ;;  %s752_s18 = scalar_lea.vmem (!%p188_p10), [#allocation2], %s227_s26 }
  0x13   : > { %p231_p12 = scmp.lt.s32.totalorder (!%p188_p10), %s740_s28, 6  ;;  %p463_p0 = scmp.ne.s32.totalorder (!%p188_p10), %s632_s12, 0 }
  0x17   : > { %s232_s29 = scalar_select %p231_p12, %s740_s28, 6 }
  0x18   : > { %276 = sbr.rel (%p463_p0) target bundleno = 31 (0x1f), region = 32  ;;  %v650_v0 = vmov (!%p463_p0), 0.0  }
  0x19   : > { %s458_s30 = sshll.u32 %s232_s29, 1  ;;  %277 = vst [vmem:[%s752_s18] sm:$0x1] (!%p463_p0), %v650_v0 }
  0x1a   : > { %p238_p13 = scmp.lt.s32.totalorder %s458_s30, 12 }
  0x1c   : > { %s844_s30 = smov (!%p238_p13, %s458_s30), 12 }
  0x1d   : > { %s459_s3 = sshll.u32 %s844_s30, 3 }
  0x1e   : > { %s241_s6 = scalar_lea.vmem %s825_s0, %s459_s3  ;;  %s263_s17 = scalar_lea.vmem %s826_s1, %s459_s3 }
  0x1f PF: > { %v278_v1 = vld [vmem:[%s241_s6] sm:$0xff]  ;;  %vm292_vm0 = vcmask 261120   ;;  %v279_v2 = vld [vmem:[%s241_s6 + $0x8] sm:$0xff]  ;;  %v651_v5 = vmov 0   ;;  %v282_v13 = vlaneseq  ;;  %s465_s12 = sshll.u32 %s740_s28, 4  ;;  %vm341_vm5 = vcmask 7168  }
  0x20   : > { %v280_v3 = vld [vmem:[%s263_s17] sm:$0xff]  ;;  %v293_v4 = vsel %vm292_vm0, %v278_v1, -inf  ;;  %544 = vset.pattern.permute.xlu1 %v651_v5  ;;  %545 = vset.pattern.permute.xlu0 %v651_v5  ;;  %v296_v6 = vsel %vm292_vm0, %v279_v2, -inf  ;;  %v281_v7 = vld [vmem:[%s263_s17 + $0x8] sm:$0xff]  ;;  %v331_v29 = vstv %s465_s12  ;;  %s466_s23 = sshll.u32 %s636_s13, 4  ;;  %s370_s24 = sshll.u32 %s752_s18, 4  ;;  %s771_s24 = int_to_ptr.vmem [resolvable:$true] %s370_s24 }
  0x21   : > { %294 = vmax.xlane.f32.xlu0 %v293_v4  ;;  %285 = vperm.xlu1 %544, %v280_v3   ;;  %v283_v16 = vand.u32 127, %v282_v13  ;;  %v329_v28 = vshrl.u32 %v282_v13, 7  ;;  %v340_v55 = vld [vmem:[%s752_s18] sm:$0x1]  ;;  %s769_s30 = scalar_lea.hbm %s827_s2, %s466_s23  ;;  %s358_s3 = scalar_lea.sflag [#allocation3], %s227_s26 }
  0x22   : > { %s554_s4 = scalar_lea.vmem %s771_s24, 16  ;;  %s652_s13 = smov [#allocation2]  }
  0x23   : > { %v330_v32 = vadd.s32 8, %v329_v28  ;;  %v332_v34 = vadd.s32 %v331_v29, %v329_v28  ;;  %p555_p1 = scmp.ne.s32.totalorder %s771_s24, %s554_s4  ;;  %s558_s5 = sshll.u32 %s652_s13, 4  ;;  %s559_s5 = int_to_ptr.vmem [resolvable:$false] %s558_s5 }
  0x24   : > { %s560_s6 = scalar_lea.vmem %s559_s5, 32  ;;  %p561_p5 = scmp.lt.s32.totalorder %s771_s24, %s559_s5 }
  0x25   : > { %297 = vmax.xlane.f32.xlu0 %v296_v6  ;;  %288 = vperm.xlu1 %544, %v281_v7   ;;  %v333_v37 = vadd.s32 %v331_v29, %v330_v32  ;;  %vm334_vm3 = vcmp.lt.s32.totalorder %v332_v34, 100  ;;  %p556_p2 = pnand %p555_p1, %p717_p3  ;;  %p562_p6 = scmp.lt.s32.totalorder %s560_s6, %s554_s4 }
  0x27   : > { %vm335_vm4 = vcmp.lt.s32.totalorder %v333_v37, 100  ;;  %p557_p4 = pneg %p556_p2  ;;  %p563_p7 = por %p562_p6, %p561_p5 }
  0x29   : > { %p564_p8 = pnand %p563_p7, %p557_p4 }
  0xa0   : > { %v286_v15 = vpop.permute.xlu1 %285 }
  0xa1   : > { %vm290_vm1 = vcmp.eq.s32.totalorder %v283_v16, %v286_v15 }
  0xa4   : > { %v289_v18 = vpop.permute.xlu1 %288 }
  0xa5   : > { %vm291_vm2 = vcmp.eq.s32.totalorder %v283_v16, %v289_v18 }
  0xae   : > { %v295_v8 = vpop.xlane.xlu0 %294 }
  0xaf   : > { %v299_v9 = vsub.f32 %v278_v1, %v295_v8 }
  0xb1   : > { %v301_v10 = vmul.f32 1.442695, %v299_v9  ;;  %v315_v20 = vsel %vm290_vm1, %v299_v9, 0.0 }
  0xb2   : > { %v298_v11 = vpop.xlane.xlu0 %297  ;;  %v317_v22 = vsel %vm292_vm0, %v315_v20, 0.0 }
  0xb3   : > { %546 = vpow2.f32 %v301_v10  ;;  %v300_v12 = vsub.f32 %v279_v2, %v298_v11 }
  0xb5   : > { %v303_v14 = vmul.f32 1.442695, %v300_v12  ;;  %v316_v24 = vsel %vm291_vm2, %v300_v12, 0.0 }
  0xb6   : > { %v320_v25 = vsel %vm292_vm0, %v316_v24, 0.0 }
  0xb7   : > { %548 = vpow2.f32 %v303_v14 }
  0xbd   : > { %v547_v17 = vpop.eup %546 }
  0xbe   : > { %v305_v19 = vsel %vm292_vm0, %v547_v17, 0.0 }
  0xbf   : > { %306 = vadd.xlane.f32.xlu0 %v305_v19 }
  0xc1   : > { %v549_v21 = vpop.eup %548 }
  0xc2   : > { %v308_v23 = vsel %vm292_vm0, %v549_v21, 0.0 }
  0xc3   : > { %318 = vadd.xlane.f32.xlu0 %v317_v22  ;;  %309 = vadd.xlane.f32.xlu1 %v308_v23 }
  0xc7   : > { %321 = vadd.xlane.f32.xlu0 %v320_v25 }
 0x14c   : > { %v307_v26 = vpop.xlane.xlu0 %306 }
 0x14d   : > { %550 = vlog2.f32 %v307_v26 }
 0x150   : > { %v310_v27 = vpop.xlane.xlu1 %309  ;;  %v319_v31 = vpop.xlane.xlu0 %318 }
 0x151   : > { %552 = vlog2.f32 %v310_v27 }
 0x154   : > { %v322_v40 = vpop.xlane.xlu0 %321 }
 0x157   : > { %v551_v30 = vpop.eup %550 }
 0x158   : > { %v312_v33 = vmul.f32 0.6931472, %v551_v30 }
 0x15a   : > { %v323_v35 = vsub.f32 %v319_v31, %v312_v33 }
 0x15b   : > { %v553_v36 = vpop.eup %552 }
 0x15c   : > { %v336_v38 = vsub.f32 0.0, %v323_v35  ;;  %v314_v39 = vmul.f32 0.6931472, %v553_v36 }
 0x15e   : > { %v324_v41 = vsub.f32 %v322_v40, %v314_v39  ;;  %v338_v42 = vsel %vm334_vm3, %v336_v38, 0.0 }
 0x15f   : > { %v342_v45 = vsel %vm341_vm5, %v338_v42, 0.0 }
 0x160   : > { %v337_v43 = vsub.f32 0.0, %v324_v41 }
 0x162   : > { %v339_v44 = vsel %vm335_vm4, %v337_v43, 0.0 }
 0x163   : > { %v343_v46 = vsel %vm341_vm5, %v339_v44, 0.0 }
 0x164   : > { %v344_v47 = vadd.f32 %v343_v46, %v342_v45 }
 0x166   : > { %345 = vadd.xlane.f32.xlu0 %v344_v47 }
 0x1f3   : > { %v346_v48 = vpop.xlane.xlu0 %345 }
 0x1f4   : > { %v347_v49 = vrot.slane %v346_v48, 4 }
 0x1f6   : > { %v348_v50 = vadd.f32 %v347_v49, %v346_v48 }
 0x1f8   : > { %v349_v51 = vrot.slane %v348_v50, 2 }
 0x1fa   : > { %v350_v52 = vadd.f32 %v349_v51, %v348_v50 }
 0x1fc   : > { %v351_v53 = vrot.slane %v350_v52, 1 }
 0x1fe   : > { %v352_v54 = vadd.f32 %v351_v53, %v350_v52 }
 0x200   : > { %469 = vpush %v352_v54 }
 0x231   : > { %s470_s27 = spop %469 }
 0x232   : > { %v354_v56 = vstv %s470_s27 }
 0x233   : > { %v355_v57 = vadd.f32 %v354_v56, %v340_v55 }
 0x235   : > { %356 = vst [vmem:[%s752_s18] sm:$0x1] %v355_v57 }
 0x236   : > { %567 = shalt.err (!%p564_p8)
}
 0x237   : > { %s568_s26 = scalar_lea.hbm %s769_s30, 16  ;;  %s572_s17 = scalar_lea.hbm %s827_s2, 32 }
 0x238   : > { %p569_p10 = scmp.ne.s32.totalorder %s769_s30, %s568_s26  ;;  %p573_p13 = scmp.lt.u32.totalorder %s769_s30, %s827_s2 }
 0x239   : > { %p574_p0 = scmp.lt.u32.totalorder %s572_s17, %s568_s26  ;;  %p576_p2 = scmp.lt.u32.totalorder %s568_s26, %s769_s30 }
 0x23a   : > { %p570_p11 = pnand %p569_p10, %p717_p3 }
 0x23b   : > { %p575_p1 = por %p574_p0, %p573_p13 }
 0x23c   : > { %p571_p12 = pneg %p570_p11 }
 0x23d   : > { %p577_p4 = por %p576_p2, %p575_p1 }
 0x23f   : > { %p578_p5 = pnand %p577_p4, %p571_p12 }
 0x241   : > { %581 = shalt.err (!%p578_p5)
}
 0x242   : > { %471 = dma.vmem_to_hbm [thread:$0]  (%p717_p3), %s771_s24, 16, %s769_s30, %s358_s3  }
 0x243 PF: > { %p477_p6 = scmp.ge.s32.totalorder %s648_s16, 2  ;;  %s382_s23 = sand.u32 1, %s620_s9  }
 0x244   : > { %s383_s27 = scalar_lea.sflag [#allocation3], %s382_s23 }
 0x245   : > { %p474_p7 = pnand %p477_p6, %p727_p9 }
 0x247   : > { %615 = dma.done.wait (!%p474_p7), %s383_s27, 16  }
 0x248   : > { %617 = vsyncadd (!%p474_p7), %s383_s27, 4294967280  ;;  %s15_s16 = sadd.s32 1, %s648_s16   ;;  %s830_s9 = smov %s624_s10 }
 0x249   : > { %p12_p8 = scmp.ge.s32.totalorder %s15_s16, 10   ;;  %s831_s10 = smov %s628_s11 }
 0x24a   : > { %s832_s11 = smov %s735_s25  ;;  %s833_s12 = smov %s640_s14 }
 0x24b   : > { %s834_s13 = smov %s644_s15  ;;  %s835_s14 = smov %s838_s19 }
 0x24c   : > { %s836_s15 = smov %s842_s20  ;;  %14 = sbr.rel (!%p12_p8) target bundleno = 5 (0x5), region = 70 }
 0x253   :  { %387 = vsyncpa [#allocation3], 1 }
 0x254   :  { %389 = vsyncpa [#allocation3 + $0x1], 1 }

</bundles_post_ra>
